<compile_context>
chip_gen: v6e
topology: v6e:2x2x1
jax: 0.10.0
libtpu: 0.0.40
codegen_flags: <defaults>
</compile_context>

<pallas_src>
import jax
import jax.numpy as jnp
from jax.experimental import pallas as pl
from jax.experimental.pallas import tpu as pltpu

LAYERS = [2, 20, 20, 20, 20, 20, 20, 1]
DEPTH = len(LAYERS) - 1          # 7 linear layers
N_HIDDEN_MATMULS = DEPTH - 2     # 5 hidden (20, 20) layers (layers 1..5)


def _tensorcores_per_chip():
    """Best-effort TensorCores-per-chip count.

    v7x (and v4/v5p megacore) expose 2 TensorCores that share the "parallel"
    grid axis; v5e / v6e have a single TensorCore.  Detection failure safely
    defaults to 1 (i.e. no tile splitting)."""
    try:
        kind = (getattr(jax.devices()[0], "device_kind", "") or "").lower()
    except Exception:
        return 1
    if any(tag in kind for tag in ("v7", "7x", "v4", "v5p")):
        return 2
    return 1


def _mlp_kernel(x_ref, w0_ref, wmid_ref, wout_ref, bhid_ref, bout_ref, o_ref):
    """Whole MLP forward for one batch tile, entirely in VMEM.

    Shapes (batch on lanes):
      x_ref    : (2, tile_n)   VMEM
      w0_ref   : (20, 2)       VMEM
      wmid_ref : (5, 20, 20)   VMEM  (layers 1..5)
      wout_ref : (1, 20)       VMEM
      bhid_ref : (6, 20, 1)    VMEM  (biases of layers 0..5)
      bout_ref : (1,)          SMEM  (output-layer bias scalar)
      o_ref    : (1, tile_n)   VMEM
    """
    # Layer 0: (20, 2) @ (2, tile_n) -> (20, tile_n), bias, tanh (EUP).
    h = jnp.dot(w0_ref[...], x_ref[...], preferred_element_type=jnp.float32)
    h = jnp.tanh(h + bhid_ref[0])

    # Hidden layers 1..5: (20, 20) @ (20, tile_n), bias, tanh.
    for j in range(N_HIDDEN_MATMULS):
        h = jnp.dot(wmid_ref[j], h, preferred_element_type=jnp.float32)
        h = jnp.tanh(h + bhid_ref[j + 1])

    # Output layer 6: (1, 20) @ (20, tile_n) -> lane-dense (1, tile_n) store.
    o = jnp.dot(wout_ref[...], h, preferred_element_type=jnp.float32)
    o_ref[...] = (o + bout_ref[0]).astype(o_ref.dtype)


def dnn_forward(x, weights, biases, *, tile_n=8192):
    """Forward pass.

    x       : (N, 2) float32 (arbitrary N; ragged last tile handled by Pallas).
    weights : list of 7 arrays, weights[i] has shape (out_i, in_i)  (PyTorch layout).
    biases  : list of 7 arrays, biases[i] has shape (out_i,).
    returns : (N, 1) float32.
    """
    n, d_in = x.shape
    assert d_in == LAYERS[0]
    assert tile_n > 0 and tile_n % 128 == 0

    if n == 0:
        return jnp.zeros((0, LAYERS[-1]), jnp.float32)

    # Lane-rounded batch size; never make the tile bigger than needed.
    n128 = ((n + 127) // 128) * 128
    tile = min(tile_n, n128)

    # Megacore-aware split: only on 2-TC chips, and only halve ONCE so both
    # TensorCores get one large, balanced tile (v5e/v6e: whole N in one tile).
    if _tensorcores_per_chip() >= 2 and tile > 128 and pl.cdiv(n, tile) < 2:
        tile = max(128, ((tile // 2 + 127) // 128) * 128)

    grid = (pl.cdiv(n, tile),)

    # Batch-on-lanes input layout; no explicit padding (Pallas masks the
    # ragged last block, and the math is lane-independent).
    xt = x.astype(jnp.float32).T                                       # (2, N)

    # Consolidated parameter operands (PyTorch-native (out, in) weight layout).
    w0 = weights[0].astype(jnp.float32)                                # (20, 2)
    w_mid = jnp.stack([w.astype(jnp.float32)
                       for w in weights[1:DEPTH - 1]])                 # (5, 20, 20)
    w_out = weights[DEPTH - 1].astype(jnp.float32)                     # (1, 20)
    b_hid = jnp.stack([b.astype(jnp.float32)[:, None]
                       for b in biases[:DEPTH - 1]])                   # (6, 20, 1)
    b_out = biases[DEPTH - 1].astype(jnp.float32).reshape(1)           # (1,) -> SMEM

    in_specs = [
        pl.BlockSpec((LAYERS[0], tile), lambda i: (0, i)),             # x
        pl.BlockSpec(w0.shape, lambda i: (0, 0)),                      # w0
        pl.BlockSpec(w_mid.shape, lambda i: (0, 0, 0)),                # w_mid
        pl.BlockSpec(w_out.shape, lambda i: (0, 0)),                   # w_out
        pl.BlockSpec(b_hid.shape, lambda i: (0, 0, 0)),                # b_hid
        pl.BlockSpec(memory_space=pltpu.MemorySpace.SMEM),             # b_out scalar
    ]
    out_specs = pl.BlockSpec((1, tile), lambda i: (0, i))

    # Rough cost hint: 2060 MACs + 120 tanh per point.
    param_bytes = 4 * sum(int(w.size) for w in weights) + 4 * sum(int(b.size) for b in biases)
    cost = pl.CostEstimate(
        flops=2 * 2060 * n,
        transcendentals=120 * n,
        bytes_accessed=4 * 3 * n + param_bytes,
    )

    out_t = pl.pallas_call(
        _mlp_kernel,
        out_shape=jax.ShapeDtypeStruct((1, n), jnp.float32),
        grid_spec=pltpu.PrefetchScalarGridSpec(
            num_scalar_prefetch=0,
            grid=grid,
            in_specs=in_specs,
            out_specs=out_specs,
        ),
        compiler_params=pltpu.CompilerParams(
            dimension_semantics=("parallel",)),
        cost_estimate=cost,
    )(xt, w0, w_mid, w_out, b_hid, b_out)

    return out_t.T  # (N, 1)


def init_params(key):
    """Deterministic init mimicking torch.nn.Linear defaults.

    Weights in PyTorch-native (out_features, in_features) layout, biases (out,)."""
    weights, biases = [], []
    for i in range(DEPTH):
        fan_in, fan_out = LAYERS[i], LAYERS[i + 1]
        key, kw, kb = jax.random.split(key, 3)
        bound = 1.0 / jnp.sqrt(jnp.float32(fan_in))
        w = jax.random.uniform(kw, (fan_out, fan_in), jnp.float32,
                               minval=-bound, maxval=bound)
        b = jax.random.uniform(kb, (fan_out,), jnp.float32,
                               minval=-bound, maxval=bound)
        weights.append(w)
        biases.append(b)
    return weights, biases


def dnn_ref(x, weights, biases):
    h = x
    for i in range(DEPTH):
        h = h @ weights[i].T + biases[i]
        if i < DEPTH - 1:
            h = jnp.tanh(h)
    return h


if __name__ == "__main__":
    key = jax.random.PRNGKey(0)
    key, kx = jax.random.split(key)

    # Small, module-consistent shapes: N collocation points with 2 coords.
    # N deliberately NOT a multiple of 128 to exercise the ragged last block.
    N = 300
    x = jax.random.normal(kx, (N, LAYERS[0]), dtype=jnp.float32)

    weights, biases = init_params(key)

    out = dnn_forward(x, weights, biases)
    out = jax.block_until_ready(out)

    # Sanity check against a pure-JAX reference.
    ref = dnn_ref(x, weights, biases)
    assert out.shape == (N, 1)
    assert jnp.max(jnp.abs(out - ref)) < 1e-5

    print("KERNEL_OK")
</pallas_src>

<mosaic_0001>
module attributes {stable_mosaic.version = 11 : i64} {
  func.func @_mlp_kernel(%arg0: i32, %arg1: memref<2x384xf32, #tpu.memory_space<vmem>>, %arg2: memref<20x2xf32, #tpu.memory_space<vmem>>, %arg3: memref<5x20x20xf32, #tpu.memory_space<vmem>>, %arg4: memref<1x20xf32, #tpu.memory_space<vmem>>, %arg5: memref<6x20x1xf32, #tpu.memory_space<vmem>>, %arg6: memref<1xf32, #tpu.memory_space<smem>>, %arg7: memref<1x384xf32, #tpu.memory_space<vmem>>) attributes {dimension_semantics = [#tpu.dimension_semantics<parallel>], iteration_bounds = array<i64: 1>, scalar_prefetch = 0 : i64, scratch_operands = 0 : i64, tpu.core_type = #tpu.core_type<tc>, window_params = [{transform_indices = @transform_0, window_bounds = array<i64: 2, 384>}, {pipeline_mode = #tpu.pipeline_mode<synchronous>, transform_indices = @transform_1, window_bounds = array<i64: 20, 2>}, {pipeline_mode = #tpu.pipeline_mode<synchronous>, transform_indices = @transform_2, window_bounds = array<i64: 5, 20, 20>}, {pipeline_mode = #tpu.pipeline_mode<synchronous>, transform_indices = @transform_3, window_bounds = array<i64: 1, 20>}, {pipeline_mode = #tpu.pipeline_mode<synchronous>, transform_indices = @transform_4, window_bounds = array<i64: 6, 20, 1>}, {transform_indices = @transform_5, window_bounds = array<i64: 1>}, {transform_indices = @transform_6, window_bounds = array<i64: 1, 384>}]} {
    %c0 = arith.constant 0 : index
    %c0_0 = arith.constant 0 : index
    %0 = vector.load %arg2[%c0, %c0_0] : memref<20x2xf32, #tpu.memory_space<vmem>>, vector<20x2xf32>
    %c0_1 = arith.constant 0 : index
    %c0_2 = arith.constant 0 : index
    %1 = vector.load %arg1[%c0_1, %c0_2] : memref<2x384xf32, #tpu.memory_space<vmem>>, vector<2x384xf32>
    %cst = arith.constant dense<0.000000e+00> : vector<20x384xf32>
    %2 = tpu.matmul %0, %1, %cst {dimension_numbers = #tpu.dot_dimension_numbers<[1], [0], [0], [1], [0, 0, 1, 1], [], []>} : vector<20x2xf32>, vector<2x384xf32>, vector<20x384xf32> -> vector<20x384xf32>
    %c0_3 = arith.constant 0 : index
    %c0_4 = arith.constant 0 : index
    %c0_5 = arith.constant 0 : index
    %3 = vector.load %arg5[%c0_3, %c0_4, %c0_5] : memref<6x20x1xf32, #tpu.memory_space<vmem>>, vector<1x20x1xf32>
    %4 = vector.shape_cast %3 : vector<1x20x1xf32> to vector<20x1xf32>
    %5 = vector.broadcast %4 : vector<20x1xf32> to vector<20x384xf32>
    %6 = arith.addf %2, %5 : vector<20x384xf32>
    %7 = math.tanh %6 : vector<20x384xf32>
    %c0_6 = arith.constant 0 : index
    %c0_7 = arith.constant 0 : index
    %c0_8 = arith.constant 0 : index
    %8 = vector.load %arg3[%c0_6, %c0_7, %c0_8] : memref<5x20x20xf32, #tpu.memory_space<vmem>>, vector<1x20x20xf32>
    %9 = vector.shape_cast %8 : vector<1x20x20xf32> to vector<20x20xf32>
    %cst_9 = arith.constant dense<0.000000e+00> : vector<20x384xf32>
    %10 = tpu.matmul %9, %7, %cst_9 {dimension_numbers = #tpu.dot_dimension_numbers<[1], [0], [0], [1], [0, 0, 1, 1], [], []>} : vector<20x20xf32>, vector<20x384xf32>, vector<20x384xf32> -> vector<20x384xf32>
    %c1 = arith.constant 1 : index
    %c0_10 = arith.constant 0 : index
    %c0_11 = arith.constant 0 : index
    %11 = vector.load %arg5[%c1, %c0_10, %c0_11] : memref<6x20x1xf32, #tpu.memory_space<vmem>>, vector<1x20x1xf32>
    %12 = vector.shape_cast %11 : vector<1x20x1xf32> to vector<20x1xf32>
    %13 = vector.broadcast %12 : vector<20x1xf32> to vector<20x384xf32>
    %14 = arith.addf %10, %13 : vector<20x384xf32>
    %15 = math.tanh %14 : vector<20x384xf32>
    %c1_12 = arith.constant 1 : index
    %c0_13 = arith.constant 0 : index
    %c0_14 = arith.constant 0 : index
    %16 = vector.load %arg3[%c1_12, %c0_13, %c0_14] : memref<5x20x20xf32, #tpu.memory_space<vmem>>, vector<1x20x20xf32>
    %17 = vector.shape_cast %16 : vector<1x20x20xf32> to vector<20x20xf32>
    %cst_15 = arith.constant dense<0.000000e+00> : vector<20x384xf32>
    %18 = tpu.matmul %17, %15, %cst_15 {dimension_numbers = #tpu.dot_dimension_numbers<[1], [0], [0], [1], [0, 0, 1, 1], [], []>} : vector<20x20xf32>, vector<20x384xf32>, vector<20x384xf32> -> vector<20x384xf32>
    %c2 = arith.constant 2 : index
    %c0_16 = arith.constant 0 : index
    %c0_17 = arith.constant 0 : index
    %19 = vector.load %arg5[%c2, %c0_16, %c0_17] : memref<6x20x1xf32, #tpu.memory_space<vmem>>, vector<1x20x1xf32>
    %20 = vector.shape_cast %19 : vector<1x20x1xf32> to vector<20x1xf32>
    %21 = vector.broadcast %20 : vector<20x1xf32> to vector<20x384xf32>
    %22 = arith.addf %18, %21 : vector<20x384xf32>
    %23 = math.tanh %22 : vector<20x384xf32>
    %c2_18 = arith.constant 2 : index
    %c0_19 = arith.constant 0 : index
    %c0_20 = arith.constant 0 : index
    %24 = vector.load %arg3[%c2_18, %c0_19, %c0_20] : memref<5x20x20xf32, #tpu.memory_space<vmem>>, vector<1x20x20xf32>
    %25 = vector.shape_cast %24 : vector<1x20x20xf32> to vector<20x20xf32>
    %cst_21 = arith.constant dense<0.000000e+00> : vector<20x384xf32>
    %26 = tpu.matmul %25, %23, %cst_21 {dimension_numbers = #tpu.dot_dimension_numbers<[1], [0], [0], [1], [0, 0, 1, 1], [], []>} : vector<20x20xf32>, vector<20x384xf32>, vector<20x384xf32> -> vector<20x384xf32>
    %c3 = arith.constant 3 : index
    %c0_22 = arith.constant 0 : index
    %c0_23 = arith.constant 0 : index
    %27 = vector.load %arg5[%c3, %c0_22, %c0_23] : memref<6x20x1xf32, #tpu.memory_space<vmem>>, vector<1x20x1xf32>
    %28 = vector.shape_cast %27 : vector<1x20x1xf32> to vector<20x1xf32>
    %29 = vector.broadcast %28 : vector<20x1xf32> to vector<20x384xf32>
    %30 = arith.addf %26, %29 : vector<20x384xf32>
    %31 = math.tanh %30 : vector<20x384xf32>
    %c3_24 = arith.constant 3 : index
    %c0_25 = arith.constant 0 : index
    %c0_26 = arith.constant 0 : index
    %32 = vector.load %arg3[%c3_24, %c0_25, %c0_26] : memref<5x20x20xf32, #tpu.memory_space<vmem>>, vector<1x20x20xf32>
    %33 = vector.shape_cast %32 : vector<1x20x20xf32> to vector<20x20xf32>
    %cst_27 = arith.constant dense<0.000000e+00> : vector<20x384xf32>
    %34 = tpu.matmul %33, %31, %cst_27 {dimension_numbers = #tpu.dot_dimension_numbers<[1], [0], [0], [1], [0, 0, 1, 1], [], []>} : vector<20x20xf32>, vector<20x384xf32>, vector<20x384xf32> -> vector<20x384xf32>
    %c4 = arith.constant 4 : index
    %c0_28 = arith.constant 0 : index
    %c0_29 = arith.constant 0 : index
    %35 = vector.load %arg5[%c4, %c0_28, %c0_29] : memref<6x20x1xf32, #tpu.memory_space<vmem>>, vector<1x20x1xf32>
    %36 = vector.shape_cast %35 : vector<1x20x1xf32> to vector<20x1xf32>
    %37 = vector.broadcast %36 : vector<20x1xf32> to vector<20x384xf32>
    %38 = arith.addf %34, %37 : vector<20x384xf32>
    %39 = math.tanh %38 : vector<20x384xf32>
    %c4_30 = arith.constant 4 : index
    %c0_31 = arith.constant 0 : index
    %c0_32 = arith.constant 0 : index
    %40 = vector.load %arg3[%c4_30, %c0_31, %c0_32] : memref<5x20x20xf32, #tpu.memory_space<vmem>>, vector<1x20x20xf32>
    %41 = vector.shape_cast %40 : vector<1x20x20xf32> to vector<20x20xf32>
    %cst_33 = arith.constant dense<0.000000e+00> : vector<20x384xf32>
    %42 = tpu.matmul %41, %39, %cst_33 {dimension_numbers = #tpu.dot_dimension_numbers<[1], [0], [0], [1], [0, 0, 1, 1], [], []>} : vector<20x20xf32>, vector<20x384xf32>, vector<20x384xf32> -> vector<20x384xf32>
    %c5 = arith.constant 5 : index
    %c0_34 = arith.constant 0 : index
    %c0_35 = arith.constant 0 : index
    %43 = vector.load %arg5[%c5, %c0_34, %c0_35] : memref<6x20x1xf32, #tpu.memory_space<vmem>>, vector<1x20x1xf32>
    %44 = vector.shape_cast %43 : vector<1x20x1xf32> to vector<20x1xf32>
    %45 = vector.broadcast %44 : vector<20x1xf32> to vector<20x384xf32>
    %46 = arith.addf %42, %45 : vector<20x384xf32>
    %47 = math.tanh %46 : vector<20x384xf32>
    %c0_36 = arith.constant 0 : index
    %c0_37 = arith.constant 0 : index
    %48 = vector.load %arg4[%c0_36, %c0_37] : memref<1x20xf32, #tpu.memory_space<vmem>>, vector<1x20xf32>
    %cst_38 = arith.constant dense<0.000000e+00> : vector<1x384xf32>
    %49 = tpu.matmul %48, %47, %cst_38 {dimension_numbers = #tpu.dot_dimension_numbers<[1], [0], [0], [1], [0, 0, 1, 1], [], []>} : vector<1x20xf32>, vector<20x384xf32>, vector<1x384xf32> -> vector<1x384xf32>
    %c0_39 = arith.constant 0 : index
    %50 = memref.load %arg6[%c0_39] : memref<1xf32, #tpu.memory_space<smem>>
    %51 = vector.broadcast %50 : f32 to vector<1x384xf32>
    %52 = arith.addf %49, %51 : vector<1x384xf32>
    %c0_40 = arith.constant 0 : index
    %c0_41 = arith.constant 0 : index
    %53 = vector.load %arg7[%c0_40, %c0_41] : memref<1x384xf32, #tpu.memory_space<vmem>>, vector<1x384xf32>
    tpu.vector_store %arg7[%c0_40, %c0_41], %52 {strides = array<i32>} : memref<1x384xf32, #tpu.memory_space<vmem>>, vector<1x384xf32>,
    return
  }
  func.func @transform_0(%arg0: i32) -> (i32, i32) {
    %c0_i32 = arith.constant 0 : i32
    %c0_i32_0 = arith.constant 0 : i32
    return %c0_i32, %arg0 : i32, i32
  }
  func.func @transform_1(%arg0: i32) -> (i32, i32) {
    %c0_i32 = arith.constant 0 : i32
    %c0_i32_0 = arith.constant 0 : i32
    %c0_i32_1 = arith.constant 0 : i32
    return %c0_i32, %c0_i32_0 : i32, i32
  }
  func.func @transform_2(%arg0: i32) -> (i32, i32, i32) {
    %c0_i32 = arith.constant 0 : i32
    %c0_i32_0 = arith.constant 0 : i32
    %c0_i32_1 = arith.constant 0 : i32
    %c0_i32_2 = arith.constant 0 : i32
    return %c0_i32, %c0_i32_0, %c0_i32_1 : i32, i32, i32
  }
  func.func @transform_3(%arg0: i32) -> (i32, i32) {
    %c0_i32 = arith.constant 0 : i32
    %c0_i32_0 = arith.constant 0 : i32
    %c0_i32_1 = arith.constant 0 : i32
    return %c0_i32, %c0_i32_0 : i32, i32
  }
  func.func @transform_4(%arg0: i32) -> (i32, i32, i32) {
    %c0_i32 = arith.constant 0 : i32
    %c0_i32_0 = arith.constant 0 : i32
    %c0_i32_1 = arith.constant 0 : i32
    %c0_i32_2 = arith.constant 0 : i32
    return %c0_i32, %c0_i32_0, %c0_i32_1 : i32, i32, i32
  }
  func.func @transform_5(%arg0: i32) -> i32 {
    %c0_i32 = arith.constant 0 : i32
    %c0_i32_0 = arith.constant 0 : i32
    return %c0_i32 : i32
  }
  func.func @transform_6(%arg0: i32) -> (i32, i32) {
    %c0_i32 = arith.constant 0 : i32
    %c0_i32_0 = arith.constant 0 : i32
    return %c0_i32, %arg0 : i32, i32
  }
}

</mosaic_0001>

<bundles_post_ra>
// kernel: tpu_custom_call.1
= control target key start
LH: loop header
LB: loop body
LE: loop exit
PB: predicated region body
PF: predicated region fallthrough
CT: control target
= control target key end

     0   :  { %v52_v1 = vlaneseq  ;;  %v1879_v2 = vmov 0.0   ;;  %v1880_v3 = vmov 1983009808   ;;  %vm1881_vm0 = vmmov 0   ;;  %s2181_s0 = inlined_call_operand.vmem [shape: f32[2,300], index: 0, kind: input, shape index: {}]   ;;  %s2182_s1 = inlined_call_operand.vmem [shape: f32[20,2], index: 1, kind: input, shape index: {}]   ;;  %s2183_s2 = inlined_call_operand.vmem [shape: f32[5,20,20], index: 2, kind: input, shape index: {}]   ;;  %s2184_s3 = inlined_call_operand.vmem [shape: f32[1,20], index: 3, kind: input, shape index: {}]   ;;  %s2185_s4 = inlined_call_operand.vmem [shape: f32[6,20,1], index: 4, kind: input, shape index: {}]   ;;  %s2186_s5 = inlined_call_operand.<no memory space> [shape: f32[1], index: 5, kind: input, shape index: {}]   ;;  %s2187_s6 = inlined_call_operand.hbm [shape: f32[1,300], index: 6, kind: output, shape index: {}]  }
   0x1   :  { %v28_v0 = vld [vmem:[%s2181_s0] sm:$0x3f]  ;;  %1645 = vmatprep.subr.mxu1 %v1879_v2  ;;  %v50_v4 = vunpack.c.l.s4 %v1880_v3  ;;  %145 = vmatprep.mubr.f32.mxu0 %v1879_v2  ;;  %v31_v6 = vld [vmem:[%s2185_s4 + $0x10] sm:$0xf]  ;;  %v1882_v10 = vmov 0   ;;  %v30_v12 = vld [vmem:[%s2185_s4 + $0x8] sm:$0xff] }
   0x2   :  { %v1926_v5 = vshrl.u32 %v52_v1, 7  ;;  %1647 = vmatprep.mubr.msk.f32.mxu1 %vm1881_vm0, %v1879_v2  ;;  %v29_v7 = vld [vmem:[%s2185_s4] sm:$0xff]  ;;  %v48_v8 = vcombine.high %v28_v0, %v28_v0  ;;  %1746 = vset.pattern.permute.xlu0 %v1882_v10  ;;  %v1532_v13 = vld [vmem:[%s2185_s4 + $0x28] sm:$0xf]  ;;  %vm74_vm1 = vcmask 1041408   ;;  %vm64_vm2 = vcmask 15360  }
   0x3   :  { %v51_v9 = vunpack.c.0.s8 %v50_v4  ;;  %1747 = vset.pattern.permute.xlu1 %v1882_v10  ;;  %44 = vperm.xlu0 %1746, %v31_v6   ;;  %v25_v15 = vld [vmem:[%s2182_s1] sm:$0xff] }
   0x4   :  { %34 = vperm.xlu1 %1747, %v29_v7  }
   0x5   :  { %v54_v11 = vsub.s32 %v51_v9, %v1926_v5 }
   0x7   :  { %v62_v14 = vrot.slane %v48_v8, %v54_v11  ;;  %v55_v16 = vrot.slane %v28_v0, %v54_v11  ;;  %39 = vperm.xlu0 %1746, %v30_v12  }
   0x8   :  { %272 = vperm.xlu1 %1747, %v1532_v13  }
   0x9   :  { %12 = vsyncpa [#allocation4], 0  ;;  %1646 = vmatpush3.msk.msra.mxu1 %vm74_vm1, %v62_v14  ;;  %v63_v17 = vcombine.high %v55_v16, %v55_v16  ;;  %v1531_v18 = vld [vmem:[%s2185_s4 + $0x20] sm:$0xff]  ;;  %v1530_v19 = vld [vmem:[%s2185_s4 + $0x18] sm:$0xff]  ;;  %vm285_vm3 = vcmask 1043456   ;;  %vm275_vm4 = vcmask 162816  }
   0xa   :  { %1648 = vmatmul.mubr.msk.f32.vlgmr.msra.gmra.mxu1 %vm64_vm2, %v25_v15  ;;  %1656 = vmatprep.subr.mxu1 %v1879_v2  ;;  %v26_v20 = vld [vmem:[%s2182_s1 + $0x8] sm:$0xff]  ;;  %v1547_v21 = vld [vmem:[%s2185_s4 + $0x40] sm:$0xf]  ;;  %v1546_v22 = vld [vmem:[%s2185_s4 + $0x38] sm:$0xff]  ;;  %s1884_s18 = smov [#allocation3]   ;;  %vm1504_vm5 = vcmp.lt.s32.totalorder %v52_v1, 384 }
   0xb   :  { %1521 = vmatprep.subr.msk.mxu0 %vm74_vm1, %v63_v17  ;;  %1650 = vmatprep.mubr.msk.f32.mxu1 %vm1881_vm0, %v1879_v2  ;;  %v27_v23 = vld [vmem:[%s2182_s1 + $0x10] sm:$0xf]  ;;  %v1562_v25 = vld [vmem:[%s2185_s4 + $0x58] sm:$0xf]  ;;  %v1560_v27 = vld [vmem:[%s2185_s4 + $0x48] sm:$0xff]  ;;  %s1513_s19 = sshll.u32 %s1884_s18, 4  ;;  %s1514_s19 = int_to_ptr.vmem [resolvable:$true] %s1513_s19 }
   0xc   :  { %1522 = vmatpush1.msk.msra.mxu0 %vm74_vm1, %v55_v16  ;;  %267 = vperm.xlu0 %1746, %v1531_v18   ;;  %v1545_v24 = vld [vmem:[%s2185_s4 + $0x30] sm:$0xff]  ;;  %v1576_v29 = vld [vmem:[%s2185_s4 + $0x68] sm:$0xff]  ;;  %v1575_v30 = vld [vmem:[%s2185_s4 + $0x60] sm:$0xff]  ;;  %s1857_s20 = scalar_lea.vmem %s1514_s19, 48  ;;  %p1862_p1 = scmp.lt.s32.totalorder %s1514_s19, %s1514_s19 }
   0xd   :  { %1523 = vmatmul.mubr.msk.f32.vlgmr.msra.gmra.mxu0 %vm64_vm2, %v25_v15  ;;  %262 = vperm.xlu1 %1747, %v1530_v19   ;;  %v1561_v26 = vld [vmem:[%s2185_s4 + $0x50] sm:$0xff]  ;;  %v1592_v31 = vld [vmem:[%s2185_s4 + $0x88] sm:$0xf]  ;;  %v1591_v32 = vld [vmem:[%s2185_s4 + $0x80] sm:$0xff]  ;;  %p1858_p0 = scmp.ne.s32.totalorder %s1514_s19, %s1857_s20 }
   0xe   :  { %1651 = vmatmul.mubr.msk.f32.gmra.mxu1 %vm64_vm2, %v26_v20  ;;  %151 = vmatprep.mubr.f32.mxu0 %v1879_v2  ;;  %v1577_v28 = vld [vmem:[%s2185_s4 + $0x70] sm:$0xf]  ;;  %v1590_v33 = vld [vmem:[%s2185_s4 + $0x78] sm:$0xff]  ;;  %v253_v61 = vld [vmem:[%s2183_s2] sm:$0xff] }
   0xf   :  { %1653 = vmatprep.mubr.msk.f32.mxu1 %vm1881_vm0, %v1879_v2  ;;  %v254_v3 = vld [vmem:[%s2183_s2 + $0x8] sm:$0xff]  ;;  %v255_v8 = vld [vmem:[%s2183_s2 + $0x10] sm:$0xf] }
  0x10   :  { %487 = vperm.xlu0 %1746, %v1547_v21  }
  0x11   :  { %1524 = vmatmul.mubr.msk.f32.gmra.mxu0 %vm64_vm2, %v26_v20  ;;  %482 = vperm.xlu1 %1747, %v1546_v22  }
  0x12   :  { %1654 = vmatmul.mubr.msk.f32.gmra.mxu1 %vm64_vm2, %v27_v23  ;;  %157 = vmatprep.mubr.f32.mxu0 %v1879_v2 }
  0x13   :  { %1662 = vmatprep.mubr.msk.f32.mxu1 %vm1881_vm0, %v1879_v2 }
  0x14   :  { %477 = vperm.xlu0 %1746, %v1545_v24  }
  0x15   :  { %1525 = vmatmul.mubr.msk.f32.gmra.mxu0 %vm64_vm2, %v27_v23  ;;  %700 = vperm.xlu1 %1747, %v1562_v25  }
  0x16   :  { %359 = vmatprep.mubr.f32.mxu0 %v1879_v2 }
  0x18   :  { %695 = vperm.xlu0 %1746, %v1561_v26  }
  0x19   :  { %690 = vperm.xlu1 %1747, %v1560_v27  }
  0x1c   :  { %913 = vperm.xlu0 %1746, %v1577_v28  }
  0x1d   :  { %908 = vperm.xlu1 %1747, %v1576_v29  }
  0x20   :  { %903 = vperm.xlu0 %1746, %v1575_v30  }
  0x21   :  { %1126 = vperm.xlu1 %1747, %v1592_v31  }
  0x24   :  { %1121 = vperm.xlu0 %1746, %v1591_v32  }
  0x25   :  { %1116 = vperm.xlu1 %1747, %v1590_v33  }
  0x7e   :  { %v45_v34 = vpop.permute.xlu0 %44 }
  0x7f   :  { %v35_v44 = vpop.permute.xlu1 %34 }
  0x82   :  { %v40_v39 = vpop.permute.xlu0 %39 }
  0x83   :  { %v273_v12 = vpop.permute.xlu1 %272 }
  0x87   :  { %v268_v17 = vpop.permute.xlu0 %267 }
  0x88   :  { %v263_v22 = vpop.permute.xlu1 %262 }
  0xca   :  { %v230_v35 = vpop.f32.mrf.mxu1 }
  0xcb   :  { %v231_v46 = vadd.f32 %v230_v35, %v35_v44  ;;  %v1542_v35 = vld [vmem:[%s2183_s2 + $0x18] sm:$0xff] }
  0xcc   :  { %v1649_v36 = vpop.f32.mrf.mxu1 }
  0xcd   :  { %v147_v37 = vpop.f32.mrf.mxu0 }
  0xce   :  { %v235_v38 = vpop.f32.mrf.mxu1  ;;  %v148_v57 = vadd.f32 %v147_v37, %v35_v44 }
  0xcf   :  { %v149_v40 = vpop.f32.mrf.mxu0  ;;  %v236_v41 = vadd.f32 %v235_v38, %v40_v39  ;;  %v1543_v38 = vld [vmem:[%s2183_s2 + $0x20] sm:$0xff] }
  0xd0   :  { %v1652_v42 = vpop.f32.mrf.mxu1  ;;  %v150_v56 = vadd.f32 %v149_v40, %v35_v44 }
  0xd1   :  { %v153_v43 = vpop.f32.mrf.mxu0  ;;  %1749 = vtanh.f32 %v236_v41 }
  0xd2   :  { %v240_v45 = vpop.f32.mrf.mxu1  ;;  %v154_v55 = vadd.f32 %v153_v43, %v40_v39  ;;  %v1544_v43 = vld [vmem:[%s2183_s2 + $0x28] sm:$0xf] }
  0xd3   :  { %v241_v47 = vadd.f32 %v240_v45, %v45_v34  ;;  %v155_v48 = vpop.f32.mrf.mxu0 }
  0xd4   :  { %v1655_v49 = vpop.f32.mrf.mxu1  ;;  %v156_v53 = vadd.f32 %v155_v48, %v40_v39 }
  0xd5   :  { %1751 = vtanh.f32 %v241_v47  ;;  %v159_v50 = vpop.f32.mrf.mxu0  ;;  %v488_v47 = vpop.permute.xlu0 %487 }
  0xd6   :  { %1753 = vtanh.f32 %v231_v46  ;;  %v160_v51 = vadd.f32 %v159_v50, %v45_v34  ;;  %v483_v50 = vpop.permute.xlu1 %482 }
  0xd7   :  { %v161_v52 = vpop.f32.mrf.mxu0 }
  0xd8   :  { %v162_v54 = vadd.f32 %v161_v52, %v45_v34 }
  0xda   :  { %1755 = vtanh.f32 %v162_v54 }
  0xdb   :  { %1757 = vtanh.f32 %v160_v51 }
  0xdc   :  { %1759 = vtanh.f32 %v156_v53  ;;  %v478_v53 = vpop.permute.xlu0 %477 }
  0xdd   :  { %1761 = vtanh.f32 %v154_v55 }
  0xde   :  { %1763 = vtanh.f32 %v150_v56  ;;  %v1750_v58 = vpop.eup %1749 }
  0xdf   :  { %1765 = vtanh.f32 %v148_v57 }
  0xe2   :  { %v1752_v59 = vpop.eup %1751 }
  0xe3   :  { %1657 = vmatpush3.msk.msra.mxu1 %vm285_vm3, %v1752_v59  ;;  %v1754_v60 = vpop.eup %1753 }
  0xe4   :  { %1658 = vmatprep.subr.mxu1 %v1879_v2 }
  0xe5   :  { %1659 = vmatpush3.msra.mxu1 %v1750_v58 }
  0xe6   :  { %1660 = vmatprep.subr.mxu1 %v1879_v2 }
  0xe7   :  { %v1756_v62 = vpop.eup %1755  ;;  %1661 = vmatpush3.msra.mxu1 %v1754_v60 }
  0xe8   :  { %v1758_v63 = vpop.eup %1757  ;;  %1533 = vmatprep.subr.msk.mxu0 %vm285_vm3, %v1756_v62  ;;  %1663 = vmatmul.mubr.msk.f32.vlgmr.msra.gmra.mxu1 %vm275_vm4, %v253_v61 }
  0xe9   :  { %v1760_v0 = vpop.eup %1759  ;;  %1534 = vmatpush1.msk.msra.mxu0 %vm285_vm3, %v1758_v63  ;;  %1665 = vmatprep.mubr.msk.f32.mxu1 %vm1881_vm0, %v1879_v2 }
  0xea   :  { %v1762_v4 = vpop.eup %1761  ;;  %323 = vmatprep.subr.mxu0 %v1760_v0  ;;  %1671 = vmatprep.subr.mxu1 %v1879_v2 }
  0xeb   :  { %v1764_v6 = vpop.eup %1763  ;;  %324 = vmatpush1.msra.mxu0 %v1762_v4 }
  0xec   :  { %v1766_v7 = vpop.eup %1765  ;;  %325 = vmatprep.subr.mxu0 %v1764_v6  ;;  %1666 = vmatmul.mubr.msk.f32.gmra.mxu1 %vm275_vm4, %v254_v3 }
  0xed   :  { %326 = vmatpush1.msra.mxu0 %v1766_v7  ;;  %1668 = vmatprep.mubr.msk.f32.mxu1 %vm1881_vm0, %v1879_v2 }
  0xee   :  { %1535 = vmatmul.mubr.msk.f32.vlgmr.msra.gmra.mxu0 %vm275_vm4, %v253_v61 }
  0xef   :  { %365 = vmatprep.mubr.f32.mxu0 %v1879_v2 }
  0xf0   :  { %1669 = vmatmul.mubr.msk.f32.gmra.mxu1 %vm275_vm4, %v255_v8 }
  0xf1   :  { %1677 = vmatprep.mubr.msk.f32.mxu1 %vm1881_vm0, %v1879_v2 }
  0xf2   :  { %1536 = vmatmul.mubr.msk.f32.gmra.mxu0 %vm275_vm4, %v254_v3 }
  0xf3   :  { %371 = vmatprep.mubr.f32.mxu0 %v1879_v2 }
  0xf6   :  { %1537 = vmatmul.mubr.msk.f32.gmra.mxu0 %vm275_vm4, %v255_v8 }
  0xf7   :  { %572 = vmatprep.mubr.f32.mxu0 %v1879_v2 }
 0x1a8   :  { %v444_v9 = vpop.f32.mrf.mxu1 }
 0x1a9   :  { %v445_v23 = vadd.f32 %v444_v9, %v263_v22 }
 0x1aa   :  { %v1664_v10 = vpop.f32.mrf.mxu1 }
 0x1ab   :  { %v1557_v10 = vld [vmem:[%s2183_s2 + $0x30] sm:$0xff] }
 0x1ac   :  { %v449_v11 = vpop.f32.mrf.mxu1 }
 0x1ad   :  { %v450_v19 = vadd.f32 %v449_v11, %v268_v17 }
 0x1ae   :  { %v361_v13 = vpop.f32.mrf.mxu0  ;;  %v1667_v14 = vpop.f32.mrf.mxu1 }
 0x1af   :  { %v362_v32 = vadd.f32 %v361_v13, %v263_v22 }
 0x1b0   :  { %v363_v15 = vpop.f32.mrf.mxu0  ;;  %v454_v16 = vpop.f32.mrf.mxu1 }
 0x1b1   :  { %v455_v18 = vadd.f32 %v454_v16, %v273_v12  ;;  %v364_v31 = vadd.f32 %v363_v15, %v263_v22  ;;  %v1559_v15 = vld [vmem:[%s2183_s2 + $0x40] sm:$0xf]  ;;  %v701_v22 = vpop.permute.xlu1 %700 }
 0x1b2   :  { %v367_v20 = vpop.f32.mrf.mxu0  ;;  %v1670_v21 = vpop.f32.mrf.mxu1 }
 0x1b3   :  { %1767 = vtanh.f32 %v455_v18  ;;  %v368_v30 = vadd.f32 %v367_v20, %v268_v17 }
 0x1b4   :  { %v369_v24 = vpop.f32.mrf.mxu0  ;;  %1769 = vtanh.f32 %v450_v19 }
 0x1b5   :  { %1771 = vtanh.f32 %v445_v23  ;;  %v370_v28 = vadd.f32 %v369_v24, %v268_v17 }
 0x1b6   :  { %v373_v25 = vpop.f32.mrf.mxu0 }
 0x1b7   :  { %v374_v26 = vadd.f32 %v373_v25, %v273_v12  ;;  %v696_v25 = vpop.permute.xlu0 %695 }
 0x1b8   :  { %v375_v27 = vpop.f32.mrf.mxu0 }
 0x1b9   :  { %v376_v29 = vadd.f32 %v375_v27, %v273_v12  ;;  %v1558_v12 = vld [vmem:[%s2183_s2 + $0x38] sm:$0xff] }
 0x1bb   :  { %1773 = vtanh.f32 %v376_v29  ;;  %v691_v29 = vpop.permute.xlu1 %690 }
 0x1bc   :  { %1775 = vtanh.f32 %v374_v26 }
 0x1bd   :  { %1777 = vtanh.f32 %v370_v28 }
 0x1be   :  { %1779 = vtanh.f32 %v368_v30 }
 0x1bf   :  { %1781 = vtanh.f32 %v364_v31 }
 0x1c0   :  { %1783 = vtanh.f32 %v362_v32  ;;  %v1768_v33 = vpop.eup %1767 }
 0x1c1   :  { %1672 = vmatpush3.msk.msra.mxu1 %vm285_vm3, %v1768_v33  ;;  %v1770_v34 = vpop.eup %1769 }
 0x1c2   :  { %1673 = vmatprep.subr.mxu1 %v1879_v2  ;;  %v1772_v36 = vpop.eup %1771 }
 0x1c3   :  { %1674 = vmatpush3.msra.mxu1 %v1770_v34 }
 0x1c4   :  { %1675 = vmatprep.subr.mxu1 %v1879_v2 }
 0x1c5   :  { %1676 = vmatpush3.msra.mxu1 %v1772_v36 }
 0x1c6   :  { %1678 = vmatmul.mubr.msk.f32.vlgmr.msra.gmra.mxu1 %vm275_vm4, %v1542_v35  ;;  %1686 = vmatprep.subr.mxu1 %v1879_v2 }
 0x1c7   :  { %1680 = vmatprep.mubr.msk.f32.mxu1 %vm1881_vm0, %v1879_v2 }
 0x1c8   :  { %v1774_v37 = vpop.eup %1773 }
 0x1c9   :  { %v1776_v39 = vpop.eup %1775  ;;  %1548 = vmatprep.subr.msk.mxu0 %vm285_vm3, %v1774_v37 }
 0x1ca   :  { %v1778_v40 = vpop.eup %1777  ;;  %1549 = vmatpush1.msk.msra.mxu0 %vm285_vm3, %v1776_v39  ;;  %1681 = vmatmul.mubr.msk.f32.gmra.mxu1 %vm275_vm4, %v1543_v38 }
 0x1cb   :  { %v1780_v41 = vpop.eup %1779  ;;  %536 = vmatprep.subr.mxu0 %v1778_v40  ;;  %1683 = vmatprep.mubr.msk.f32.mxu1 %vm1881_vm0, %v1879_v2 }
 0x1cc   :  { %v1782_v42 = vpop.eup %1781  ;;  %537 = vmatpush1.msra.mxu0 %v1780_v41 }
 0x1cd   :  { %v1784_v44 = vpop.eup %1783  ;;  %538 = vmatprep.subr.mxu0 %v1782_v42 }
 0x1ce   :  { %539 = vmatpush1.msra.mxu0 %v1784_v44  ;;  %1684 = vmatmul.mubr.msk.f32.gmra.mxu1 %vm275_vm4, %v1544_v43 }
 0x1cf   :  { %1550 = vmatmul.mubr.msk.f32.vlgmr.msra.gmra.mxu0 %vm275_vm4, %v1542_v35  ;;  %1692 = vmatprep.mubr.msk.f32.mxu1 %vm1881_vm0, %v1879_v2 }
 0x1d0   :  { %578 = vmatprep.mubr.f32.mxu0 %v1879_v2 }
 0x1d3   :  { %1551 = vmatmul.mubr.msk.f32.gmra.mxu0 %vm275_vm4, %v1543_v38 }
 0x1d4   :  { %584 = vmatprep.mubr.f32.mxu0 %v1879_v2 }
 0x1d7   :  { %1552 = vmatmul.mubr.msk.f32.gmra.mxu0 %vm275_vm4, %v1544_v43 }
 0x1d8   :  { %785 = vmatprep.mubr.f32.mxu0 %v1879_v2 }
 0x286   :  { %v657_v45 = vpop.f32.mrf.mxu1 }
 0x287   :  { %v658_v58 = vadd.f32 %v657_v45, %v478_v53 }
 0x288   :  { %v1679_v46 = vpop.f32.mrf.mxu1 }
 0x289   :  { %v1572_v46 = vld [vmem:[%s2183_s2 + $0x48] sm:$0xff] }
 0x28a   :  { %v662_v48 = vpop.f32.mrf.mxu1 }
 0x28b   :  { %v663_v54 = vadd.f32 %v662_v48, %v483_v50  ;;  %v1573_v48 = vld [vmem:[%s2183_s2 + $0x50] sm:$0xff] }
 0x28c   :  { %v1682_v49 = vpop.f32.mrf.mxu1 }
 0x28d   :  { %v1574_v49 = vld [vmem:[%s2183_s2 + $0x58] sm:$0xf] }
 0x28e   :  { %v667_v51 = vpop.f32.mrf.mxu1 }
 0x28f   :  { %v574_v52 = vpop.f32.mrf.mxu0  ;;  %v668_v55 = vadd.f32 %v667_v51, %v488_v47 }
 0x290   :  { %v1685_v57 = vpop.f32.mrf.mxu1  ;;  %v575_v7 = vadd.f32 %v574_v52, %v478_v53 }
 0x291   :  { %v576_v56 = vpop.f32.mrf.mxu0  ;;  %1785 = vtanh.f32 %v668_v55 }
 0x292   :  { %1787 = vtanh.f32 %v663_v54  ;;  %v577_v6 = vadd.f32 %v576_v56, %v478_v53 }
 0x293   :  { %v580_v59 = vpop.f32.mrf.mxu0  ;;  %1789 = vtanh.f32 %v658_v58  ;;  %v914_v58 = vpop.permute.xlu0 %913 }
 0x294   :  { %v581_v4 = vadd.f32 %v580_v59, %v483_v50 }
 0x295   :  { %v582_v60 = vpop.f32.mrf.mxu0 }
 0x296   :  { %v583_v0 = vadd.f32 %v582_v60, %v483_v50 }
 0x297   :  { %v586_v61 = vpop.f32.mrf.mxu0 }
 0x298   :  { %v587_v62 = vadd.f32 %v586_v61, %v488_v47  ;;  %v909_v61 = vpop.permute.xlu1 %908 }
 0x299   :  { %v588_v63 = vpop.f32.mrf.mxu0 }
 0x29a   :  { %v589_v3 = vadd.f32 %v588_v63, %v488_v47 }
 0x29c   :  { %1791 = vtanh.f32 %v589_v3  ;;  %v904_v3 = vpop.permute.xlu0 %903 }
 0x29d   :  { %1793 = vtanh.f32 %v587_v62 }
 0x29e   :  { %1795 = vtanh.f32 %v583_v0  ;;  %v1786_v8 = vpop.eup %1785 }
 0x29f   :  { %1797 = vtanh.f32 %v581_v4  ;;  %1687 = vmatpush3.msk.msra.mxu1 %vm285_vm3, %v1786_v8  ;;  %v1788_v9 = vpop.eup %1787 }
 0x2a0   :  { %1799 = vtanh.f32 %v577_v6  ;;  %1688 = vmatprep.subr.mxu1 %v1879_v2  ;;  %v1790_v11 = vpop.eup %1789 }
 0x2a1   :  { %1801 = vtanh.f32 %v575_v7  ;;  %1689 = vmatpush3.msra.mxu1 %v1788_v9 }
 0x2a2   :  { %1690 = vmatprep.subr.mxu1 %v1879_v2 }
 0x2a3   :  { %1691 = vmatpush3.msra.mxu1 %v1790_v11 }
 0x2a4   :  { %1693 = vmatmul.mubr.msk.f32.vlgmr.msra.gmra.mxu1 %vm275_vm4, %v1557_v10  ;;  %1701 = vmatprep.subr.mxu1 %v1879_v2 }
 0x2a5   :  { %1695 = vmatprep.mubr.msk.f32.mxu1 %vm1881_vm0, %v1879_v2 }
 0x2a8   :  { %1696 = vmatmul.mubr.msk.f32.gmra.mxu1 %vm275_vm4, %v1558_v12 }
 0x2a9   :  { %v1792_v13 = vpop.eup %1791  ;;  %1698 = vmatprep.mubr.msk.f32.mxu1 %vm1881_vm0, %v1879_v2 }
 0x2aa   :  { %v1794_v14 = vpop.eup %1793  ;;  %1563 = vmatprep.subr.msk.mxu0 %vm285_vm3, %v1792_v13 }
 0x2ab   :  { %v1796_v16 = vpop.eup %1795  ;;  %1564 = vmatpush1.msk.msra.mxu0 %vm285_vm3, %v1794_v14 }
 0x2ac   :  { %v1798_v17 = vpop.eup %1797  ;;  %749 = vmatprep.subr.mxu0 %v1796_v16  ;;  %1699 = vmatmul.mubr.msk.f32.gmra.mxu1 %vm275_vm4, %v1559_v15 }
 0x2ad   :  { %v1800_v18 = vpop.eup %1799  ;;  %750 = vmatpush1.msra.mxu0 %v1798_v17  ;;  %1707 = vmatprep.mubr.msk.f32.mxu1 %vm1881_vm0, %v1879_v2 }
 0x2ae   :  { %v1802_v19 = vpop.eup %1801  ;;  %751 = vmatprep.subr.mxu0 %v1800_v18 }
 0x2af   :  { %752 = vmatpush1.msra.mxu0 %v1802_v19 }
 0x2b0   :  { %1565 = vmatmul.mubr.msk.f32.vlgmr.msra.gmra.mxu0 %vm275_vm4, %v1557_v10 }
 0x2b1   :  { %791 = vmatprep.mubr.f32.mxu0 %v1879_v2 }
 0x2b4   :  { %1566 = vmatmul.mubr.msk.f32.gmra.mxu0 %vm275_vm4, %v1558_v12 }
 0x2b5   :  { %797 = vmatprep.mubr.f32.mxu0 %v1879_v2 }
 0x2b8   :  { %1567 = vmatmul.mubr.msk.f32.gmra.mxu0 %vm275_vm4, %v1559_v15 }
 0x2b9   :  { %998 = vmatprep.mubr.f32.mxu0 %v1879_v2 }
 0x364   :  { %v870_v20 = vpop.f32.mrf.mxu1 }
 0x365   :  { %v871_v31 = vadd.f32 %v870_v20, %v691_v29  ;;  %v1587_v20 = vld [vmem:[%s2183_s2 + $0x60] sm:$0xff] }
 0x366   :  { %v1694_v21 = vpop.f32.mrf.mxu1 }
 0x368   :  { %v875_v23 = vpop.f32.mrf.mxu1 }
 0x369   :  { %v876_v27 = vadd.f32 %v875_v23, %v696_v25  ;;  %v1588_v23 = vld [vmem:[%s2183_s2 + $0x68] sm:$0xff] }
 0x36a   :  { %v1697_v24 = vpop.f32.mrf.mxu1 }
 0x36b   :  { %v1589_v24 = vld [vmem:[%s2183_s2 + $0x70] sm:$0xf] }
 0x36c   :  { %v880_v26 = vpop.f32.mrf.mxu1 }
 0x36d   :  { %v881_v28 = vadd.f32 %v880_v26, %v701_v22 }
 0x36e   :  { %v1700_v30 = vpop.f32.mrf.mxu1 }
 0x36f   :  { %1803 = vtanh.f32 %v881_v28 }
 0x370   :  { %v787_v32 = vpop.f32.mrf.mxu0  ;;  %1805 = vtanh.f32 %v876_v27 }
 0x371   :  { %1807 = vtanh.f32 %v871_v31  ;;  %v788_v44 = vadd.f32 %v787_v32, %v691_v29 }
 0x372   :  { %v789_v33 = vpop.f32.mrf.mxu0 }
 0x373   :  { %v790_v43 = vadd.f32 %v789_v33, %v691_v29  ;;  %v1127_v33 = vpop.permute.xlu1 %1126 }
 0x374   :  { %v793_v34 = vpop.f32.mrf.mxu0 }
 0x375   :  { %v794_v41 = vadd.f32 %v793_v34, %v696_v25 }
 0x376   :  { %v795_v35 = vpop.f32.mrf.mxu0 }
 0x377   :  { %v796_v39 = vadd.f32 %v795_v35, %v696_v25 }
 0x378   :  { %v799_v36 = vpop.f32.mrf.mxu0 }
 0x379   :  { %v800_v37 = vadd.f32 %v799_v36, %v701_v22  ;;  %v1122_v36 = vpop.permute.xlu0 %1121 }
 0x37a   :  { %v801_v38 = vpop.f32.mrf.mxu0 }
 0x37b   :  { %v802_v40 = vadd.f32 %v801_v38, %v701_v22 }
 0x37c   :  { %v1804_v42 = vpop.eup %1803 }
 0x37d   :  { %1809 = vtanh.f32 %v802_v40  ;;  %1702 = vmatpush3.msk.msra.mxu1 %vm285_vm3, %v1804_v42  ;;  %v1806_v45 = vpop.eup %1805  ;;  %v1117_v40 = vpop.permute.xlu1 %1116 }
 0x37e   :  { %1811 = vtanh.f32 %v800_v37  ;;  %1703 = vmatprep.subr.mxu1 %v1879_v2  ;;  %v1808_v47 = vpop.eup %1807 }
 0x37f   :  { %1813 = vtanh.f32 %v796_v39  ;;  %1704 = vmatpush3.msra.mxu1 %v1806_v45 }
 0x380   :  { %1815 = vtanh.f32 %v794_v41  ;;  %1705 = vmatprep.subr.mxu1 %v1879_v2 }
 0x381   :  { %1817 = vtanh.f32 %v790_v43  ;;  %1706 = vmatpush3.msra.mxu1 %v1808_v47 }
 0x382   :  { %1819 = vtanh.f32 %v788_v44  ;;  %1708 = vmatmul.mubr.msk.f32.vlgmr.msra.gmra.mxu1 %vm275_vm4, %v1572_v46  ;;  %1716 = vmatprep.subr.mxu1 %v1879_v2 }
 0x383   :  { %1710 = vmatprep.mubr.msk.f32.mxu1 %vm1881_vm0, %v1879_v2 }
 0x386   :  { %1711 = vmatmul.mubr.msk.f32.gmra.mxu1 %vm275_vm4, %v1573_v48 }
 0x387   :  { %1713 = vmatprep.mubr.msk.f32.mxu1 %vm1881_vm0, %v1879_v2 }
 0x38a   :  { %v1810_v50 = vpop.eup %1809  ;;  %1714 = vmatmul.mubr.msk.f32.gmra.mxu1 %vm275_vm4, %v1574_v49 }
 0x38b   :  { %v1812_v51 = vpop.eup %1811  ;;  %1578 = vmatprep.subr.msk.mxu0 %vm285_vm3, %v1810_v50  ;;  %1722 = vmatprep.mubr.msk.f32.mxu1 %vm1881_vm0, %v1879_v2 }
 0x38c   :  { %v1814_v52 = vpop.eup %1813  ;;  %1579 = vmatpush1.msk.msra.mxu0 %vm285_vm3, %v1812_v51 }
 0x38d   :  { %v1816_v53 = vpop.eup %1815  ;;  %962 = vmatprep.subr.mxu0 %v1814_v52 }
 0x38e   :  { %v1818_v54 = vpop.eup %1817  ;;  %963 = vmatpush1.msra.mxu0 %v1816_v53 }
 0x38f   :  { %v1820_v55 = vpop.eup %1819  ;;  %964 = vmatprep.subr.mxu0 %v1818_v54 }
 0x390   :  { %965 = vmatpush1.msra.mxu0 %v1820_v55 }
 0x391   :  { %1580 = vmatmul.mubr.msk.f32.vlgmr.msra.gmra.mxu0 %vm275_vm4, %v1572_v46 }
 0x392   :  { %1004 = vmatprep.mubr.f32.mxu0 %v1879_v2 }
 0x395   :  { %1581 = vmatmul.mubr.msk.f32.gmra.mxu0 %vm275_vm4, %v1573_v48 }
 0x396   :  { %1010 = vmatprep.mubr.f32.mxu0 %v1879_v2 }
 0x399   :  { %1582 = vmatmul.mubr.msk.f32.gmra.mxu0 %vm275_vm4, %v1574_v49 }
 0x39a   :  { %1211 = vmatprep.mubr.f32.mxu0 %v1879_v2 }
 0x442   :  { %v1083_v56 = vpop.f32.mrf.mxu1 }
 0x443   :  { %v1084_v6 = vadd.f32 %v1083_v56, %v904_v3  ;;  %v1319_v56 = vld [vmem:[%s2184_s3] sm:$0x1] }
 0x444   :  { %v1709_v57 = vpop.f32.mrf.mxu1 }
 0x446   :  { %v1088_v59 = vpop.f32.mrf.mxu1 }
 0x447   :  { %v1089_v63 = vadd.f32 %v1088_v59, %v909_v61 }
 0x448   :  { %v1712_v60 = vpop.f32.mrf.mxu1 }
 0x44a   :  { %v1093_v62 = vpop.f32.mrf.mxu1 }
 0x44b   :  { %v1094_v0 = vadd.f32 %v1093_v62, %v914_v58 }
 0x44c   :  { %v1715_v4 = vpop.f32.mrf.mxu1 }
 0x44d   :  { %1821 = vtanh.f32 %v1094_v0  ;;  %v1883_v4 = vmov 1966171168  }
 0x44e   :  { %1823 = vtanh.f32 %v1089_v63 }
 0x44f   :  { %1825 = vtanh.f32 %v1084_v6  ;;  %v1480_v6 = vunpack.c.l.s4 %v1883_v4 }
 0x451   :  { %v1000_v7 = vpop.f32.mrf.mxu0 }
 0x452   :  { %v1001_v22 = vadd.f32 %v1000_v7, %v904_v3  ;;  %v1481_v7 = vunpack.c.0.s8 %v1480_v6 }
 0x453   :  { %v1002_v8 = vpop.f32.mrf.mxu0 }
 0x454   :  { %v1003_v19 = vadd.f32 %v1002_v8, %v904_v3  ;;  %v1321_v8 = vstv %s2186_s5  ;;  %s1861_s5 = scalar_lea.vmem %s1514_s19, 64 }
 0x455   :  { %v1006_v9 = vpop.f32.mrf.mxu0  ;;  %p1863_p2 = scmp.lt.s32.totalorder %s1861_s5, %s1857_s20 }
 0x456   :  { %v1007_v18 = vadd.f32 %v1006_v9, %v909_v61 }
 0x457   :  { %v1008_v10 = vpop.f32.mrf.mxu0  ;;  %p1864_p3 = por %p1863_p2, %p1862_p1 }
 0x458   :  { %v1009_v15 = vadd.f32 %v1008_v10, %v909_v61  ;;  %v1484_v10 = vsub.s32 %v1481_v7, %v1926_v5 }
 0x459   :  { %v1012_v11 = vpop.f32.mrf.mxu0  ;;  %p1865_p4 = pnand %p1864_p3, %p1858_p0 }
 0x45a   :  { %v1822_v12 = vpop.eup %1821  ;;  %v1013_v13 = vadd.f32 %v1012_v11, %v914_v58 }
 0x45b   :  { %v1014_v14 = vpop.f32.mrf.mxu0  ;;  %1717 = vmatpush3.msk.msra.mxu1 %vm285_vm3, %v1822_v12  ;;  %v1824_v17 = vpop.eup %1823 }
 0x45c   :  { %v1015_v16 = vadd.f32 %v1014_v14, %v914_v58  ;;  %1718 = vmatprep.subr.mxu1 %v1879_v2  ;;  %v1826_v21 = vpop.eup %1825 }
 0x45d   :  { %1719 = vmatpush3.msra.mxu1 %v1824_v17 }
 0x45e   :  { %1827 = vtanh.f32 %v1015_v16  ;;  %1720 = vmatprep.subr.mxu1 %v1879_v2 }
 0x45f   :  { %1829 = vtanh.f32 %v1013_v13  ;;  %1721 = vmatpush3.msra.mxu1 %v1826_v21 }
 0x460   :  { %1831 = vtanh.f32 %v1009_v15  ;;  %1723 = vmatmul.mubr.msk.f32.vlgmr.msra.gmra.mxu1 %vm275_vm4, %v1587_v20  ;;  %1731 = vmatprep.subr.mxu1 %v1879_v2 }
 0x461   :  { %1833 = vtanh.f32 %v1007_v18  ;;  %1725 = vmatprep.mubr.msk.f32.mxu1 %vm1881_vm0, %v1879_v2 }
 0x462   :  { %1835 = vtanh.f32 %v1003_v19 }
 0x463   :  { %1837 = vtanh.f32 %v1001_v22 }
 0x464   :  { %1726 = vmatmul.mubr.msk.f32.gmra.mxu1 %vm275_vm4, %v1588_v23 }
 0x465   :  { %1728 = vmatprep.mubr.msk.f32.mxu1 %vm1881_vm0, %v1879_v2 }
 0x468   :  { %1729 = vmatmul.mubr.msk.f32.gmra.mxu1 %vm275_vm4, %v1589_v24 }
 0x469   :  { %1737 = vmatprep.mubr.msk.f32.mxu1 %vm1881_vm0, %v1879_v2 }
 0x46b   :  { %v1828_v25 = vpop.eup %1827 }
 0x46c   :  { %v1830_v26 = vpop.eup %1829  ;;  %1593 = vmatprep.subr.msk.mxu0 %vm285_vm3, %v1828_v25 }
 0x46d   :  { %v1832_v27 = vpop.eup %1831  ;;  %1594 = vmatpush1.msk.msra.mxu0 %vm285_vm3, %v1830_v26 }
 0x46e   :  { %v1834_v28 = vpop.eup %1833  ;;  %1175 = vmatprep.subr.mxu0 %v1832_v27 }
 0x46f   :  { %v1836_v29 = vpop.eup %1835  ;;  %1176 = vmatpush1.msra.mxu0 %v1834_v28 }
 0x470   :  { %v1838_v30 = vpop.eup %1837  ;;  %1177 = vmatprep.subr.mxu0 %v1836_v29 }
 0x471   :  { %1178 = vmatpush1.msra.mxu0 %v1838_v30 }
 0x472   :  { %1595 = vmatmul.mubr.msk.f32.vlgmr.msra.gmra.mxu0 %vm275_vm4, %v1587_v20 }
 0x473   :  { %1217 = vmatprep.mubr.f32.mxu0 %v1879_v2 }
 0x476   :  { %1596 = vmatmul.mubr.msk.f32.gmra.mxu0 %vm275_vm4, %v1588_v23 }
 0x477   :  { %1223 = vmatprep.mubr.f32.mxu0 %v1879_v2 }
 0x47a   :  { %1597 = vmatmul.mubr.msk.f32.gmra.mxu0 %vm275_vm4, %v1589_v24 }
 0x47b   :  { %1398 = vmatprep.mubr.f32.mxu0 %v1879_v2 }
 0x520   :  { %v1296_v31 = vpop.f32.mrf.mxu1 }
 0x521   :  { %v1297_v42 = vadd.f32 %v1296_v31, %v1117_v40 }
 0x522   :  { %v1724_v32 = vpop.f32.mrf.mxu1 }
 0x524   :  { %v1301_v34 = vpop.f32.mrf.mxu1 }
 0x525   :  { %v1302_v38 = vadd.f32 %v1301_v34, %v1122_v36 }
 0x526   :  { %v1727_v35 = vpop.f32.mrf.mxu1 }
 0x528   :  { %v1306_v37 = vpop.f32.mrf.mxu1 }
 0x529   :  { %v1307_v39 = vadd.f32 %v1306_v37, %v1127_v33 }
 0x52a   :  { %v1730_v41 = vpop.f32.mrf.mxu1 }
 0x52b   :  { %1839 = vtanh.f32 %v1307_v39 }
 0x52c   :  { %1841 = vtanh.f32 %v1302_v38 }
 0x52d   :  { %1843 = vtanh.f32 %v1297_v42 }
 0x532   :  { %v1213_v43 = vpop.f32.mrf.mxu0 }
 0x533   :  { %v1214_v58 = vadd.f32 %v1213_v43, %v1117_v40 }
 0x534   :  { %v1215_v44 = vpop.f32.mrf.mxu0 }
 0x535   :  { %v1216_v57 = vadd.f32 %v1215_v44, %v1117_v40 }
 0x536   :  { %v1219_v45 = vpop.f32.mrf.mxu0 }
 0x537   :  { %v1220_v55 = vadd.f32 %v1219_v45, %v1122_v36 }
 0x538   :  { %v1221_v46 = vpop.f32.mrf.mxu0  ;;  %v1840_v47 = vpop.eup %1839 }
 0x539   :  { %1732 = vmatpush3.msk.msra.mxu1 %vm285_vm3, %v1840_v47  ;;  %v1842_v49 = vpop.eup %1841  ;;  %v1222_v53 = vadd.f32 %v1221_v46, %v1122_v36 }
 0x53a   :  { %v1225_v48 = vpop.f32.mrf.mxu0  ;;  %1733 = vmatprep.subr.mxu1 %v1879_v2  ;;  %v1844_v52 = vpop.eup %1843 }
 0x53b   :  { %v1226_v50 = vadd.f32 %v1225_v48, %v1127_v33  ;;  %1734 = vmatpush3.msra.mxu1 %v1842_v49 }
 0x53c   :  { %v1227_v51 = vpop.f32.mrf.mxu0  ;;  %1735 = vmatprep.subr.mxu1 %v1879_v2 }
 0x53d   :  { %v1228_v54 = vadd.f32 %v1227_v51, %v1127_v33  ;;  %1736 = vmatpush3.msra.mxu1 %v1844_v52 }
 0x53e   :  { %1738 = vmatmul.mubr.msk.f32.vlgmr.msra.gmra.mxu1 %vm275_vm4, %v1319_v56 }
 0x53f   :  { %1845 = vtanh.f32 %v1228_v54 }
 0x540   :  { %1847 = vtanh.f32 %v1226_v50 }
 0x541   :  { %1849 = vtanh.f32 %v1222_v53 }
 0x542   :  { %1851 = vtanh.f32 %v1220_v55 }
 0x543   :  { %1853 = vtanh.f32 %v1216_v57 }
 0x544   :  { %1855 = vtanh.f32 %v1214_v58 }
 0x54c   :  { %v1846_v59 = vpop.eup %1845 }
 0x54d   :  { %v1848_v60 = vpop.eup %1847  ;;  %1602 = vmatprep.subr.msk.mxu0 %vm285_vm3, %v1846_v59 }
 0x54e   :  { %v1850_v2 = vpop.eup %1849  ;;  %1603 = vmatpush1.msk.msra.mxu0 %vm285_vm3, %v1848_v60 }
 0x54f   :  { %v1852_v61 = vpop.eup %1851  ;;  %1362 = vmatprep.subr.mxu0 %v1850_v2 }
 0x550   :  { %v1854_v62 = vpop.eup %1853  ;;  %1363 = vmatpush1.msra.mxu0 %v1852_v61 }
 0x551   :  { %v1856_v63 = vpop.eup %1855  ;;  %1364 = vmatprep.subr.mxu0 %v1854_v62 }
 0x552   :  { %1365 = vmatpush1.msra.mxu0 %v1856_v63 }
 0x553   :  { %1604 = vmatmul.mubr.msk.f32.vlgmr.msra.gmra.mxu0 %vm275_vm4, %v1319_v56 }
 0x5fe   :  { %v1471_v0 = vpop.f32.mrf.mxu1 }
 0x5ff   :  { %v1472_v11 = vadd.f32 %v1471_v0, %v1321_v8 }
 0x600   :  { %v1739_v3 = vpop.f32.mrf.mxu1 }
 0x601   :  { %v1492_v16 = vrot.slane %v1472_v11, %v1484_v10 }
 0x613   :  { %v1400_v9 = vpop.f32.mrf.mxu0 }
 0x614   :  { %v1401_v13 = vadd.f32 %v1400_v9, %v1321_v8 }
 0x615   :  { %v1402_v12 = vpop.f32.mrf.mxu0 }
 0x616   :  { %v1403_v14 = vadd.f32 %v1402_v12, %v1321_v8 }
 0x618   :  { %v1478_v15 = vcombine.low %v1401_v13, %v1403_v14 }
 0x61a   :  { %v1485_v17 = vrot.slane %v1478_v15, %v1484_v10 }
 0x61c   :  { %v1493_v18 = vcombine.low %v1485_v17, %v1492_v16 }
 0x61e   :  { %v1500_v19 = vrot.slane %v1493_v18, %v1484_v10 }
 0x620   :  { %1506 = vst.msk [vmem:[#allocation3] sm:$0x7] %vm1504_vm5, %v1500_v19 }
 0x621   :  { %1868 = shalt.err (!%p1865_p4)
}
 0x622   :  { %1516 = dma.vmem_to_hbm [thread:$0]  %s1514_s19, 48, %s2187_s6, [#allocation4]  }
 0x623   :  { %1877 = dma.done.wait [#allocation4], 48  }
 0x624   :  { %1878 = vsyncadd [#allocation4], 4294967248 }
 0x625   :  { %1520 = vsyncpa [#allocation4], 1 }

</bundles_post_ra>
